<compile_context>
chip_gen: v5e
topology: v5e:2x2
jax: 0.10.0
libtpu: 0.0.40
codegen_flags: <defaults>
</compile_context>

<pallas_src>
import functools

import jax
import jax.numpy as jnp
from jax.experimental import pallas as pl
from jax.experimental.pallas import tpu as pltpu


# dtype used for the A @ X neighbour-aggregation matmuls (accumulation is f32).
# Switch to jnp.float32 for bit-exact parity with an all-f32 reference.
AGG_DTYPE = jnp.bfloat16

_VMEM = pl.BlockSpec(memory_space=pltpu.MemorySpace.VMEM)


# ----------------------------------------------------------------------------
# Fused Pallas kernel: whole Model forward in a single launch
# ----------------------------------------------------------------------------
def _l2_normalize(x):
    # F.normalize(x, p=2, dim=-1) == x / max(||x||_2, 1e-12)
    # rsqrt(max(sumsq, 1e-24)) == 1 / max(||x||_2, 1e-12)  (EUP slot, no VALU div)
    sumsq = jnp.sum(x * x, axis=-1, keepdims=True)
    return x * jax.lax.rsqrt(jnp.maximum(sumsq, 1e-24))


def fused_forward_kernel(*refs, layers):
    """Fused forward.

    refs layout (inputs..., output):
      [0] A_to_dis   (n_dis,  n_drug)  bf16 row-normalised adjacency (drug->disease)
      [1] A_to_drug  (n_drug, n_dis )  bf16 row-normalised adjacency (disease->drug)
      [2] x_drug     (n_drug, f_drug)  f32
      [3] x_dis      (n_dis,  f_dis )  f32
      [4] sel_drug   (n_pad,  n_drug)  f32  0.5 * one-hot(edge_label_index[0])
      [5] sel_dis    (n_pad,  n_dis )  f32  0.5 * one-hot(edge_label_index[1])
      then per layer i: wl_dis, bl_dis, wr_dis, wl_drug, bl_drug, wr_drug
      then head: w1, b1, w2, b2
      last: output (n_pad, 128) f32  (score broadcast across lanes)
    """
    (a2dis_ref, a2drug_ref, xdrug_ref, xdis_ref,
     sel_drug_ref, sel_dis_ref) = refs[:6]
    w_refs = refs[6:6 + 6 * layers]
    w1_ref, b1_ref, w2_ref, b2_ref = refs[6 + 6 * layers:6 + 6 * layers + 4]
    o_ref = refs[-1]

    a2dis = a2dis_ref[...]
    a2drug = a2drug_ref[...]
    z_drug = xdrug_ref[...]
    z_dis = xdis_ref[...]

    for i in range(layers):
        (wl_dis, bl_dis, wr_dis,
         wl_drug, bl_drug, wr_drug) = w_refs[6 * i:6 * (i + 1)]

        # SAGEConv (mean aggr) for edge type drug -> disease (dst = disease)
        agg_dis = jnp.dot(a2dis, z_drug.astype(AGG_DTYPE),
                          preferred_element_type=jnp.float32)
        new_dis = (jnp.dot(agg_dis, wl_dis[...],
                           preferred_element_type=jnp.float32)
                   + bl_dis[...]
                   + jnp.dot(z_dis, wr_dis[...],
                             preferred_element_type=jnp.float32))

        # SAGEConv (mean aggr) for edge type disease -> drug (dst = drug)
        agg_drug = jnp.dot(a2drug, z_dis.astype(AGG_DTYPE),
                           preferred_element_type=jnp.float32)
        new_drug = (jnp.dot(agg_drug, wl_drug[...],
                            preferred_element_type=jnp.float32)
                    + bl_drug[...]
                    + jnp.dot(z_drug, wr_drug[...],
                              preferred_element_type=jnp.float32))

        new_dis = _l2_normalize(new_dis)
        new_drug = _l2_normalize(new_drug)
        if i != layers - 1:                      # relu on all but last layer
            new_dis = jnp.maximum(new_dis, 0.0)
            new_drug = jnp.maximum(new_drug, 0.0)
        z_drug, z_dis = new_drug, new_dis

    # Linears head, aggregator_lin = 'mean'.  Edge-label gather expressed as a
    # (pre-scaled 0.5x) one-hot selection matmul so it stays in the fused kernel.
    z = (jnp.dot(sel_drug_ref[...], z_drug, preferred_element_type=jnp.float32)
         + jnp.dot(sel_dis_ref[...], z_dis, preferred_element_type=jnp.float32))
    h = jnp.maximum(jnp.dot(z, w1_ref[...],
                            preferred_element_type=jnp.float32) + b1_ref[...],
                    0.0)
    score = jnp.dot(h, w2_ref[...],
                    preferred_element_type=jnp.float32) + b2_ref[...]
    # lane-dense store: broadcast the (n_pad, 1) score column across 128 lanes
    o_ref[...] = jnp.broadcast_to(score, o_ref.shape)


# ----------------------------------------------------------------------------
# Graph preprocessing (done ONCE per graph, outside the hot forward path)
# ----------------------------------------------------------------------------
def build_mean_adjacency(src_idx, dst_idx, n_src, n_dst, dtype=AGG_DTYPE):
    """Dense row-normalised adjacency: A[i, j] = multiplicity(j -> i) / deg(i).

    Built via one-hot matmuls (segment-sum style) instead of a per-edge
    scatter; mean over an empty neighbourhood is 0 (matches PyG MeanAggregation).
    """
    oh_dst = jax.nn.one_hot(dst_idx, n_dst, dtype=jnp.float32)     # (E, n_dst)
    oh_src = jax.nn.one_hot(src_idx, n_src, dtype=jnp.float32)     # (E, n_src)
    counts = oh_dst.T @ oh_src                                     # (n_dst, n_src)
    deg = counts.sum(axis=1, keepdims=True)
    return (counts / jnp.maximum(deg, 1.0)).astype(dtype)


# ----------------------------------------------------------------------------
# Forward wrapper (single pallas_call)
# ----------------------------------------------------------------------------
def model_forward(params, x_drug, x_disease, a_to_dis, a_to_drug,
                  edge_label_index, *, layers):
    n_drug, n_dis = x_drug.shape[0], x_disease.shape[0]
    n_labels = edge_label_index.shape[1]
    n_pad = max(8, -(-n_labels // 8) * 8)        # sublane-pad the label axis

    row, col = edge_label_index
    # 0.5 "mean" factor of the Linears head folded into the one-hot selectors.
    sel_drug = jnp.pad(jax.nn.one_hot(row, n_drug, dtype=jnp.float32) * 0.5,
                       ((0, n_pad - n_labels), (0, 0)))
    sel_dis = jnp.pad(jax.nn.one_hot(col, n_dis, dtype=jnp.float32) * 0.5,
                      ((0, n_pad - n_labels), (0, 0)))

    operands = [a_to_dis, a_to_drug, x_drug, x_disease, sel_drug, sel_dis]
    for i in range(layers):
        p_dd = params["convs"][i]["drug__to__disease"]
        p_ed = params["convs"][i]["disease__to__drug"]
        operands += [p_dd["w_l"], p_dd["b_l"].reshape(1, -1), p_dd["w_r"],
                     p_ed["w_l"], p_ed["b_l"].reshape(1, -1), p_ed["w_r"]]
    lin = params["lin"]
    operands += [lin["w1"], lin["b1"].reshape(1, -1),
                 lin["w2"], lin["b2"].reshape(1, 1)]

    kernel = functools.partial(fused_forward_kernel, layers=layers)
    out = pl.pallas_call(
        kernel,
        out_shape=jax.ShapeDtypeStruct((n_pad, 128), jnp.float32),
        in_specs=[_VMEM] * len(operands),
        out_specs=_VMEM,
    )(*operands)
    return out[:n_labels, 0]


# ----------------------------------------------------------------------------
# Pure-JAX reference (same math, same dtypes) for a correctness sanity check
# ----------------------------------------------------------------------------
def reference_forward(params, x_drug, x_disease, a_to_dis, a_to_drug,
                      edge_label_index, *, layers):
    hp = jax.lax.Precision.HIGHEST
    z_drug, z_dis = x_drug, x_disease
    for i in range(layers):
        p_dd = params["convs"][i]["drug__to__disease"]
        p_ed = params["convs"][i]["disease__to__drug"]
        agg_dis = jnp.dot(a_to_dis, z_drug.astype(AGG_DTYPE),
                          preferred_element_type=jnp.float32, precision=hp)
        new_dis = (jnp.dot(agg_dis, p_dd["w_l"], precision=hp) + p_dd["b_l"]
                   + jnp.dot(z_dis, p_dd["w_r"], precision=hp))
        agg_drug = jnp.dot(a_to_drug, z_dis.astype(AGG_DTYPE),
                           preferred_element_type=jnp.float32, precision=hp)
        new_drug = (jnp.dot(agg_drug, p_ed["w_l"], precision=hp) + p_ed["b_l"]
                    + jnp.dot(z_drug, p_ed["w_r"], precision=hp))
        new_dis, new_drug = _l2_normalize(new_dis), _l2_normalize(new_drug)
        if i != layers - 1:
            new_dis = jnp.maximum(new_dis, 0.0)
            new_drug = jnp.maximum(new_drug, 0.0)
        z_drug, z_dis = new_drug, new_dis
    r, c = edge_label_index
    z = (z_drug[r] + z_dis[c]) * 0.5
    lin = params["lin"]
    h = jnp.maximum(jnp.dot(z, lin["w1"], precision=hp) + lin["b1"], 0.0)
    return (jnp.dot(h, lin["w2"], precision=hp) + lin["b2"]).reshape(-1)


# ----------------------------------------------------------------------------
# Parameter init
# ----------------------------------------------------------------------------
def init_params(key, neurons, layers, f_drug, f_disease):
    def lin_w(k, fan_in, fan_out):
        return (jax.random.normal(k, (fan_in, fan_out), jnp.float32)
                / jnp.sqrt(jnp.float32(fan_in)))

    params = {"convs": [], "lin": {}}
    for i in range(layers):
        in_drug = f_drug if i == 0 else neurons
        in_dis = f_disease if i == 0 else neurons
        key, *ks = jax.random.split(key, 7)
        params["convs"].append({
            # edge type drug -> disease (source: drug, destination: disease)
            "drug__to__disease": {
                "w_l": lin_w(ks[0], in_drug, neurons),     # lin_l (has bias)
                "b_l": jnp.zeros((neurons,), jnp.float32),
                "w_r": lin_w(ks[1], in_dis, neurons),      # lin_r (no bias)
            },
            # edge type disease -> drug
            "disease__to__drug": {
                "w_l": lin_w(ks[2], in_dis, neurons),
                "b_l": jnp.zeros((neurons,), jnp.float32),
                "w_r": lin_w(ks[3], in_drug, neurons),
            },
        })

    key, k1, k2 = jax.random.split(key, 3)
    params["lin"] = {
        "w1": lin_w(k1, neurons, neurons),
        "b1": jnp.zeros((neurons,), jnp.float32),
        "w2": lin_w(k2, neurons, 1),
        "b2": jnp.zeros((1,), jnp.float32),
    }
    return params


# ----------------------------------------------------------------------------
if __name__ == "__main__":
    neurons, layers = 32, 2
    n_drug, n_disease = 12, 10
    f_drug, f_disease = 16, 24
    n_edges, n_labels = 40, 16

    key = jax.random.PRNGKey(0)
    k_xd, k_xs, k_es, k_ed, k_lr, k_lc, k_p = jax.random.split(key, 7)

    x_drug = jax.random.normal(k_xd, (n_drug, f_drug), jnp.float32)
    x_disease = jax.random.normal(k_xs, (n_disease, f_disease), jnp.float32)

    # edge type ('drug','to','disease'): row = drug (src), col = disease (dst)
    e_src = jax.random.randint(k_es, (n_edges,), 0, n_drug)
    e_dst = jax.random.randint(k_ed, (n_edges,), 0, n_disease)
    ei_drug2dis = jnp.stack([e_src, e_dst])
    ei_dis2drug = jnp.stack([e_dst, e_src])            # reverse edge type

    edge_label_index = jnp.stack([
        jax.random.randint(k_lr, (n_labels,), 0, n_drug),
        jax.random.randint(k_lc, (n_labels,), 0, n_disease),
    ])

    params = init_params(k_p, neurons, layers, f_drug, f_disease)

    # --- graph-only preprocessing: hoisted out of the per-forward hot path ---
    A_to_dis = build_mean_adjacency(ei_drug2dis[0], ei_drug2dis[1],
                                    n_drug, n_disease)
    A_to_drug = build_mean_adjacency(ei_dis2drug[0], ei_dis2drug[1],
                                     n_disease, n_drug)

    fwd = jax.jit(functools.partial(model_forward, layers=layers))
    out = fwd(params, x_drug, x_disease, A_to_dis, A_to_drug, edge_label_index)
    out = jax.block_until_ready(out)
    assert out.shape == (n_labels,)

    ref = reference_forward(params, x_drug, x_disease, A_to_dis, A_to_drug,
                            edge_label_index, layers=layers)
    assert jnp.allclose(out, ref, atol=5e-2, rtol=5e-2), (out, ref)

    print("KERNEL_OK")
</pallas_src>

<mosaic_0001>
module attributes {stable_mosaic.version = 11 : i64} {
  func.func @fused_forward_kernel(%arg0: memref<10x12xbf16, #tpu.memory_space<vmem>>, %arg1: memref<12x10xbf16, #tpu.memory_space<vmem>>, %arg2: memref<12x16xf32, #tpu.memory_space<vmem>>, %arg3: memref<10x24xf32, #tpu.memory_space<vmem>>, %arg4: memref<16x12xf32, #tpu.memory_space<vmem>>, %arg5: memref<16x10xf32, #tpu.memory_space<vmem>>, %arg6: memref<16x32xf32, #tpu.memory_space<vmem>>, %arg7: memref<1x32xf32, #tpu.memory_space<vmem>>, %arg8: memref<24x32xf32, #tpu.memory_space<vmem>>, %arg9: memref<24x32xf32, #tpu.memory_space<vmem>>, %arg10: memref<1x32xf32, #tpu.memory_space<vmem>>, %arg11: memref<16x32xf32, #tpu.memory_space<vmem>>, %arg12: memref<32x32xf32, #tpu.memory_space<vmem>>, %arg13: memref<1x32xf32, #tpu.memory_space<vmem>>, %arg14: memref<32x32xf32, #tpu.memory_space<vmem>>, %arg15: memref<32x32xf32, #tpu.memory_space<vmem>>, %arg16: memref<1x32xf32, #tpu.memory_space<vmem>>, %arg17: memref<32x32xf32, #tpu.memory_space<vmem>>, %arg18: memref<32x32xf32, #tpu.memory_space<vmem>>, %arg19: memref<1x32xf32, #tpu.memory_space<vmem>>, %arg20: memref<32x1xf32, #tpu.memory_space<vmem>>, %arg21: memref<1x1xf32, #tpu.memory_space<vmem>>, %arg22: memref<16x128xf32, #tpu.memory_space<vmem>>) attributes {dimension_semantics = [], scalar_prefetch = 0 : i64, scratch_operands = 0 : i64, tpu.core_type = #tpu.core_type<tc>} {
    %c0 = arith.constant 0 : index
    %c0_0 = arith.constant 0 : index
    %0 = vector.load %arg0[%c0, %c0_0] : memref<10x12xbf16, #tpu.memory_space<vmem>>, vector<10x12xbf16>
    %c0_1 = arith.constant 0 : index
    %c0_2 = arith.constant 0 : index
    %1 = vector.load %arg1[%c0_1, %c0_2] : memref<12x10xbf16, #tpu.memory_space<vmem>>, vector<12x10xbf16>
    %c0_3 = arith.constant 0 : index
    %c0_4 = arith.constant 0 : index
    %2 = vector.load %arg2[%c0_3, %c0_4] : memref<12x16xf32, #tpu.memory_space<vmem>>, vector<12x16xf32>
    %c0_5 = arith.constant 0 : index
    %c0_6 = arith.constant 0 : index
    %3 = vector.load %arg3[%c0_5, %c0_6] : memref<10x24xf32, #tpu.memory_space<vmem>>, vector<10x24xf32>
    %4 = arith.truncf %2 : vector<12x16xf32> to vector<12x16xbf16>
    %cst = arith.constant dense<0.000000e+00> : vector<10x16xf32>
    %5 = tpu.matmul %0, %4, %cst {dimension_numbers = #tpu.dot_dimension_numbers<[1], [0], [0], [1], [0, 0, 1, 1], [], []>} : vector<10x12xbf16>, vector<12x16xbf16>, vector<10x16xf32> -> vector<10x16xf32>
    %c0_7 = arith.constant 0 : index
    %c0_8 = arith.constant 0 : index
    %6 = vector.load %arg6[%c0_7, %c0_8] : memref<16x32xf32, #tpu.memory_space<vmem>>, vector<16x32xf32>
    %cst_9 = arith.constant dense<0.000000e+00> : vector<10x32xf32>
    %7 = tpu.matmul %5, %6, %cst_9 {dimension_numbers = #tpu.dot_dimension_numbers<[1], [0], [0], [1], [0, 0, 1, 1], [], []>} : vector<10x16xf32>, vector<16x32xf32>, vector<10x32xf32> -> vector<10x32xf32>
    %c0_10 = arith.constant 0 : index
    %c0_11 = arith.constant 0 : index
    %8 = vector.load %arg7[%c0_10, %c0_11] : memref<1x32xf32, #tpu.memory_space<vmem>>, vector<1x32xf32>
    %9 = vector.broadcast %8 : vector<1x32xf32> to vector<10x32xf32>
    %10 = arith.addf %7, %9 : vector<10x32xf32>
    %c0_12 = arith.constant 0 : index
    %c0_13 = arith.constant 0 : index
    %11 = vector.load %arg8[%c0_12, %c0_13] : memref<24x32xf32, #tpu.memory_space<vmem>>, vector<24x32xf32>
    %cst_14 = arith.constant dense<0.000000e+00> : vector<10x32xf32>
    %12 = tpu.matmul %3, %11, %cst_14 {dimension_numbers = #tpu.dot_dimension_numbers<[1], [0], [0], [1], [0, 0, 1, 1], [], []>} : vector<10x24xf32>, vector<24x32xf32>, vector<10x32xf32> -> vector<10x32xf32>
    %13 = arith.addf %10, %12 : vector<10x32xf32>
    %14 = arith.truncf %3 : vector<10x24xf32> to vector<10x24xbf16>
    %cst_15 = arith.constant dense<0.000000e+00> : vector<12x24xf32>
    %15 = tpu.matmul %1, %14, %cst_15 {dimension_numbers = #tpu.dot_dimension_numbers<[1], [0], [0], [1], [0, 0, 1, 1], [], []>} : vector<12x10xbf16>, vector<10x24xbf16>, vector<12x24xf32> -> vector<12x24xf32>
    %c0_16 = arith.constant 0 : index
    %c0_17 = arith.constant 0 : index
    %16 = vector.load %arg9[%c0_16, %c0_17] : memref<24x32xf32, #tpu.memory_space<vmem>>, vector<24x32xf32>
    %cst_18 = arith.constant dense<0.000000e+00> : vector<12x32xf32>
    %17 = tpu.matmul %15, %16, %cst_18 {dimension_numbers = #tpu.dot_dimension_numbers<[1], [0], [0], [1], [0, 0, 1, 1], [], []>} : vector<12x24xf32>, vector<24x32xf32>, vector<12x32xf32> -> vector<12x32xf32>
    %c0_19 = arith.constant 0 : index
    %c0_20 = arith.constant 0 : index
    %18 = vector.load %arg10[%c0_19, %c0_20] : memref<1x32xf32, #tpu.memory_space<vmem>>, vector<1x32xf32>
    %19 = vector.broadcast %18 : vector<1x32xf32> to vector<12x32xf32>
    %20 = arith.addf %17, %19 : vector<12x32xf32>
    %c0_21 = arith.constant 0 : index
    %c0_22 = arith.constant 0 : index
    %21 = vector.load %arg11[%c0_21, %c0_22] : memref<16x32xf32, #tpu.memory_space<vmem>>, vector<16x32xf32>
    %cst_23 = arith.constant dense<0.000000e+00> : vector<12x32xf32>
    %22 = tpu.matmul %2, %21, %cst_23 {dimension_numbers = #tpu.dot_dimension_numbers<[1], [0], [0], [1], [0, 0, 1, 1], [], []>} : vector<12x16xf32>, vector<16x32xf32>, vector<12x32xf32> -> vector<12x32xf32>
    %23 = arith.addf %20, %22 : vector<12x32xf32>
    %24 = arith.mulf %13, %13 : vector<10x32xf32>
    %cst_24 = arith.constant dense<0.000000e+00> : vector<10xf32>
    %25 = vector.multi_reduction <add>, %24, %cst_24 [1] : vector<10x32xf32> to vector<10xf32>
    %26 = vector.shape_cast %25 : vector<10xf32> to vector<10x1xf32>
    %cst_25 = arith.constant 1.000000e-24 : f32
    %27 = vector.broadcast %cst_25 : f32 to vector<10x1xf32>
    %28 = arith.maximumf %26, %27 : vector<10x1xf32>
    %29 = math.rsqrt %28 : vector<10x1xf32>
    %30 = vector.broadcast %29 : vector<10x1xf32> to vector<10x32xf32>
    %31 = arith.mulf %13, %30 : vector<10x32xf32>
    %32 = arith.mulf %23, %23 : vector<12x32xf32>
    %cst_26 = arith.constant dense<0.000000e+00> : vector<12xf32>
    %33 = vector.multi_reduction <add>, %32, %cst_26 [1] : vector<12x32xf32> to vector<12xf32>
    %34 = vector.shape_cast %33 : vector<12xf32> to vector<12x1xf32>
    %cst_27 = arith.constant 1.000000e-24 : f32
    %35 = vector.broadcast %cst_27 : f32 to vector<12x1xf32>
    %36 = arith.maximumf %34, %35 : vector<12x1xf32>
    %37 = math.rsqrt %36 : vector<12x1xf32>
    %38 = vector.broadcast %37 : vector<12x1xf32> to vector<12x32xf32>
    %39 = arith.mulf %23, %38 : vector<12x32xf32>
    %cst_28 = arith.constant 0.000000e+00 : f32
    %40 = vector.broadcast %cst_28 : f32 to vector<10x32xf32>
    %41 = arith.maximumf %31, %40 : vector<10x32xf32>
    %cst_29 = arith.constant 0.000000e+00 : f32
    %42 = vector.broadcast %cst_29 : f32 to vector<12x32xf32>
    %43 = arith.maximumf %39, %42 : vector<12x32xf32>
    %44 = arith.truncf %43 : vector<12x32xf32> to vector<12x32xbf16>
    %cst_30 = arith.constant dense<0.000000e+00> : vector<10x32xf32>
    %45 = tpu.matmul %0, %44, %cst_30 {dimension_numbers = #tpu.dot_dimension_numbers<[1], [0], [0], [1], [0, 0, 1, 1], [], []>} : vector<10x12xbf16>, vector<12x32xbf16>, vector<10x32xf32> -> vector<10x32xf32>
    %c0_31 = arith.constant 0 : index
    %c0_32 = arith.constant 0 : index
    %46 = vector.load %arg12[%c0_31, %c0_32] : memref<32x32xf32, #tpu.memory_space<vmem>>, vector<32x32xf32>
    %cst_33 = arith.constant dense<0.000000e+00> : vector<10x32xf32>
    %47 = tpu.matmul %45, %46, %cst_33 {dimension_numbers = #tpu.dot_dimension_numbers<[1], [0], [0], [1], [0, 0, 1, 1], [], []>} : vector<10x32xf32>, vector<32x32xf32>, vector<10x32xf32> -> vector<10x32xf32>
    %c0_34 = arith.constant 0 : index
    %c0_35 = arith.constant 0 : index
    %48 = vector.load %arg13[%c0_34, %c0_35] : memref<1x32xf32, #tpu.memory_space<vmem>>, vector<1x32xf32>
    %49 = vector.broadcast %48 : vector<1x32xf32> to vector<10x32xf32>
    %50 = arith.addf %47, %49 : vector<10x32xf32>
    %c0_36 = arith.constant 0 : index
    %c0_37 = arith.constant 0 : index
    %51 = vector.load %arg14[%c0_36, %c0_37] : memref<32x32xf32, #tpu.memory_space<vmem>>, vector<32x32xf32>
    %cst_38 = arith.constant dense<0.000000e+00> : vector<10x32xf32>
    %52 = tpu.matmul %41, %51, %cst_38 {dimension_numbers = #tpu.dot_dimension_numbers<[1], [0], [0], [1], [0, 0, 1, 1], [], []>} : vector<10x32xf32>, vector<32x32xf32>, vector<10x32xf32> -> vector<10x32xf32>
    %53 = arith.addf %50, %52 : vector<10x32xf32>
    %54 = arith.truncf %41 : vector<10x32xf32> to vector<10x32xbf16>
    %cst_39 = arith.constant dense<0.000000e+00> : vector<12x32xf32>
    %55 = tpu.matmul %1, %54, %cst_39 {dimension_numbers = #tpu.dot_dimension_numbers<[1], [0], [0], [1], [0, 0, 1, 1], [], []>} : vector<12x10xbf16>, vector<10x32xbf16>, vector<12x32xf32> -> vector<12x32xf32>
    %c0_40 = arith.constant 0 : index
    %c0_41 = arith.constant 0 : index
    %56 = vector.load %arg15[%c0_40, %c0_41] : memref<32x32xf32, #tpu.memory_space<vmem>>, vector<32x32xf32>
    %cst_42 = arith.constant dense<0.000000e+00> : vector<12x32xf32>
    %57 = tpu.matmul %55, %56, %cst_42 {dimension_numbers = #tpu.dot_dimension_numbers<[1], [0], [0], [1], [0, 0, 1, 1], [], []>} : vector<12x32xf32>, vector<32x32xf32>, vector<12x32xf32> -> vector<12x32xf32>
    %c0_43 = arith.constant 0 : index
    %c0_44 = arith.constant 0 : index
    %58 = vector.load %arg16[%c0_43, %c0_44] : memref<1x32xf32, #tpu.memory_space<vmem>>, vector<1x32xf32>
    %59 = vector.broadcast %58 : vector<1x32xf32> to vector<12x32xf32>
    %60 = arith.addf %57, %59 : vector<12x32xf32>
    %c0_45 = arith.constant 0 : index
    %c0_46 = arith.constant 0 : index
    %61 = vector.load %arg17[%c0_45, %c0_46] : memref<32x32xf32, #tpu.memory_space<vmem>>, vector<32x32xf32>
    %cst_47 = arith.constant dense<0.000000e+00> : vector<12x32xf32>
    %62 = tpu.matmul %43, %61, %cst_47 {dimension_numbers = #tpu.dot_dimension_numbers<[1], [0], [0], [1], [0, 0, 1, 1], [], []>} : vector<12x32xf32>, vector<32x32xf32>, vector<12x32xf32> -> vector<12x32xf32>
    %63 = arith.addf %60, %62 : vector<12x32xf32>
    %64 = arith.mulf %53, %53 : vector<10x32xf32>
    %cst_48 = arith.constant dense<0.000000e+00> : vector<10xf32>
    %65 = vector.multi_reduction <add>, %64, %cst_48 [1] : vector<10x32xf32> to vector<10xf32>
    %66 = vector.shape_cast %65 : vector<10xf32> to vector<10x1xf32>
    %cst_49 = arith.constant 1.000000e-24 : f32
    %67 = vector.broadcast %cst_49 : f32 to vector<10x1xf32>
    %68 = arith.maximumf %66, %67 : vector<10x1xf32>
    %69 = math.rsqrt %68 : vector<10x1xf32>
    %70 = vector.broadcast %69 : vector<10x1xf32> to vector<10x32xf32>
    %71 = arith.mulf %53, %70 : vector<10x32xf32>
    %72 = arith.mulf %63, %63 : vector<12x32xf32>
    %cst_50 = arith.constant dense<0.000000e+00> : vector<12xf32>
    %73 = vector.multi_reduction <add>, %72, %cst_50 [1] : vector<12x32xf32> to vector<12xf32>
    %74 = vector.shape_cast %73 : vector<12xf32> to vector<12x1xf32>
    %cst_51 = arith.constant 1.000000e-24 : f32
    %75 = vector.broadcast %cst_51 : f32 to vector<12x1xf32>
    %76 = arith.maximumf %74, %75 : vector<12x1xf32>
    %77 = math.rsqrt %76 : vector<12x1xf32>
    %78 = vector.broadcast %77 : vector<12x1xf32> to vector<12x32xf32>
    %79 = arith.mulf %63, %78 : vector<12x32xf32>
    %c0_52 = arith.constant 0 : index
    %c0_53 = arith.constant 0 : index
    %80 = vector.load %arg4[%c0_52, %c0_53] : memref<16x12xf32, #tpu.memory_space<vmem>>, vector<16x12xf32>
    %cst_54 = arith.constant dense<0.000000e+00> : vector<16x32xf32>
    %81 = tpu.matmul %80, %79, %cst_54 {dimension_numbers = #tpu.dot_dimension_numbers<[1], [0], [0], [1], [0, 0, 1, 1], [], []>} : vector<16x12xf32>, vector<12x32xf32>, vector<16x32xf32> -> vector<16x32xf32>
    %c0_55 = arith.constant 0 : index
    %c0_56 = arith.constant 0 : index
    %82 = vector.load %arg5[%c0_55, %c0_56] : memref<16x10xf32, #tpu.memory_space<vmem>>, vector<16x10xf32>
    %cst_57 = arith.constant dense<0.000000e+00> : vector<16x32xf32>
    %83 = tpu.matmul %82, %71, %cst_57 {dimension_numbers = #tpu.dot_dimension_numbers<[1], [0], [0], [1], [0, 0, 1, 1], [], []>} : vector<16x10xf32>, vector<10x32xf32>, vector<16x32xf32> -> vector<16x32xf32>
    %84 = arith.addf %81, %83 : vector<16x32xf32>
    %c0_58 = arith.constant 0 : index
    %c0_59 = arith.constant 0 : index
    %85 = vector.load %arg18[%c0_58, %c0_59] : memref<32x32xf32, #tpu.memory_space<vmem>>, vector<32x32xf32>
    %cst_60 = arith.constant dense<0.000000e+00> : vector<16x32xf32>
    %86 = tpu.matmul %84, %85, %cst_60 {dimension_numbers = #tpu.dot_dimension_numbers<[1], [0], [0], [1], [0, 0, 1, 1], [], []>} : vector<16x32xf32>, vector<32x32xf32>, vector<16x32xf32> -> vector<16x32xf32>
    %c0_61 = arith.constant 0 : index
    %c0_62 = arith.constant 0 : index
    %87 = vector.load %arg19[%c0_61, %c0_62] : memref<1x32xf32, #tpu.memory_space<vmem>>, vector<1x32xf32>
    %88 = vector.broadcast %87 : vector<1x32xf32> to vector<16x32xf32>
    %89 = arith.addf %86, %88 : vector<16x32xf32>
    %cst_63 = arith.constant 0.000000e+00 : f32
    %90 = vector.broadcast %cst_63 : f32 to vector<16x32xf32>
    %91 = arith.maximumf %89, %90 : vector<16x32xf32>
    %c0_64 = arith.constant 0 : index
    %c0_65 = arith.constant 0 : index
    %92 = vector.load %arg20[%c0_64, %c0_65] : memref<32x1xf32, #tpu.memory_space<vmem>>, vector<32x1xf32>
    %cst_66 = arith.constant dense<0.000000e+00> : vector<16x1xf32>
    %93 = tpu.matmul %91, %92, %cst_66 {dimension_numbers = #tpu.dot_dimension_numbers<[1], [0], [0], [1], [0, 0, 1, 1], [], []>} : vector<16x32xf32>, vector<32x1xf32>, vector<16x1xf32> -> vector<16x1xf32>
    %c0_67 = arith.constant 0 : index
    %c0_68 = arith.constant 0 : index
    %94 = vector.load %arg21[%c0_67, %c0_68] : memref<1x1xf32, #tpu.memory_space<vmem>>, vector<1x1xf32>
    %95 = vector.broadcast %94 : vector<1x1xf32> to vector<16x1xf32>
    %96 = arith.addf %93, %95 : vector<16x1xf32>
    %97 = vector.shape_cast %96 : vector<16x1xf32> to vector<16x1xf32>
    %98 = vector.broadcast %97 : vector<16x1xf32> to vector<16x128xf32>
    %c0_69 = arith.constant 0 : index
    %c0_70 = arith.constant 0 : index
    %99 = vector.load %arg22[%c0_69, %c0_70] : memref<16x128xf32, #tpu.memory_space<vmem>>, vector<16x128xf32>
    tpu.vector_store %arg22[%c0_69, %c0_70], %98 {strides = array<i32>} : memref<16x128xf32, #tpu.memory_space<vmem>>, vector<16x128xf32>,
    return
  }
}

</mosaic_0001>

<bundles_post_ra>
// kernel: model_forward.1
= control target key start
LH: loop header
LB: loop body
LE: loop exit
PB: predicated region body
PF: predicated region fallthrough
CT: control target
= control target key end

     0   :  { %s1596_s0 = inlined_call_operand.hbm [shape: bf16[10,12], index: 0, kind: input, shape index: {}]   ;;  %s1597_s1 = inlined_call_operand.hbm [shape: bf16[12,10], index: 1, kind: input, shape index: {}]   ;;  %s1598_s2 = inlined_call_operand.vmem [shape: f32[12,16], index: 2, kind: input, shape index: {}]   ;;  %s1599_s3 = inlined_call_operand.hbm [shape: f32[10,24], index: 3, kind: input, shape index: {}]   ;;  %s1600_s4 = inlined_call_operand.vmem [shape: f32[16,12], index: 4, kind: input, shape index: {}]   ;;  %s1601_s5 = inlined_call_operand.vmem [shape: f32[16,10], index: 5, kind: input, shape index: {}]   ;;  %s1602_s6 = inlined_call_operand.hbm [shape: f32[16,32], index: 6, kind: input, shape index: {}]   ;;  %s1603_s7 = inlined_call_operand.vmem [shape: f32[1,32], index: 7, kind: input, shape index: {}]   ;;  %s1604_s8 = inlined_call_operand.hbm [shape: f32[24,32], index: 8, kind: input, shape index: {}]   ;;  %s1605_s9 = inlined_call_operand.hbm [shape: f32[24,32], index: 9, kind: input, shape index: {}]   ;;  %s1606_s10 = inlined_call_operand.vmem [shape: f32[1,32], index: 10, kind: input, shape index: {}]   ;;  %s1607_s11 = inlined_call_operand.hbm [shape: f32[16,32], index: 11, kind: input, shape index: {}]   ;;  %s1608_s12 = inlined_call_operand.vmem [shape: f32[32,32], index: 12, kind: input, shape index: {}]   ;;  %s1609_s13 = inlined_call_operand.vmem [shape: f32[1,32], index: 13, kind: input, shape index: {}]   ;;  %s1610_s14 = inlined_call_operand.vmem [shape: f32[32,32], index: 14, kind: input, shape index: {}]   ;;  %s1611_s15 = inlined_call_operand.hbm [shape: f32[32,32], index: 15, kind: input, shape index: {}]   ;;  %s1612_s16 = inlined_call_operand.vmem [shape: f32[1,32], index: 16, kind: input, shape index: {}]   ;;  %s1613_s17 = inlined_call_operand.hbm [shape: f32[32,32], index: 17, kind: input, shape index: {}]   ;;  %s1614_s18 = inlined_call_operand.hbm [shape: f32[32,32], index: 18, kind: input, shape index: {}]   ;;  %s1615_s19 = inlined_call_operand.vmem [shape: f32[1,32], index: 19, kind: input, shape index: {}]   ;;  %s1616_s20 = inlined_call_operand.vmem [shape: f32[32,1], index: 20, kind: input, shape index: {}]   ;;  %s1617_s21 = inlined_call_operand.<no memory space> [shape: f32[1,1], index: 21, kind: input, shape index: {}]   ;;  %s1618_s22 = inlined_call_operand.vmem [shape: f32[16,128], index: 22, kind: output, shape index: {}]  }
   0x1   :  { %1623 = sst [smem:[#allocation25_spill]] %s1596_s0  ;;  %v27_v0 = vstv %s1617_s21 }
   0x2   :  { %1624 = sst [smem:[#allocation26_spill]] %s1597_s1  ;;  %28 = vst [vmem:[#allocation2] sm:$0x1] %v27_v0 }
   0x3   :  { %1625 = sst [smem:[#allocation27_spill]] %s1598_s2 }
   0x4   :  { %1626 = sst [smem:[#allocation28_spill]] %s1599_s3 }
   0x5   :  { %1627 = sst [smem:[#allocation29_spill]] %s1600_s4 }
   0x6   :  { %1628 = sst [smem:[#allocation30_spill]] %s1601_s5 }
   0x7   :  { %1629 = sst [smem:[#allocation31_spill]] %s1602_s6 }
   0x8   :  { %29 = vsyncpa [#allocation4], 0 }
   0x9   :  { %30 = vsyncpa [#allocation6], 0 }
   0xa   :  { %31 = vsyncpa [#allocation9], 0 }
   0xb   :  { %32 = vsyncpa [#allocation12], 0 }
   0xc   :  { %33 = vsyncpa [#allocation15], 0 }
   0xd   :  { %34 = vsyncpa [#allocation18], 0  ;;  %s1630_s4 = sld [smem:[#allocation26_spill]]  ;;  %s1248_s23 = smov [#allocation5]  }
   0xe   :  { %s54_s1 = sshll.u32 %s1248_s23, 4  ;;  %s1622_s5 = smov 64   ;;  %s55_s1 = int_to_ptr.vmem [resolvable:$true] %s54_s1 }
   0xf   :  { %s1250_s24 = smov 4   ;;  %s1631_s25 = sld [smem:[#allocation31_spill]] }
  0x10   :  { %s1251_s2 = smov [#allocation8]   ;;  %s112_s29 = sshll.u32 %s1605_s9, 4  ;;  %s113_s29 = int_to_ptr.hbm [resolvable:$true] %s112_s29 }
  0x11   :  { %s86_s27 = sshll.u32 %s1251_s2, 4  ;;  %s1252_s30 = smov 128   ;;  %s87_s27 = int_to_ptr.vmem [resolvable:$true] %s86_s27 }
  0x12   :  { %s1254_s21 = smov [#allocation11]   ;;  %s1255_s9 = smov [#allocation14]  }
  0x13   :  { %s52_s0 = sshll.u32 %s1630_s4, 4  ;;  %s1253_s4 = smov 8   ;;  %s53_s0 = int_to_ptr.hbm [resolvable:$true] %s52_s0 }
  0x14   :  { %60 = dma.hbm_to_vmem [thread:$0]  %s53_s0, 128, %s55_s1, [#allocation6], %s1622_s5, %s1622_s5, %s1250_s24  }
  0x15   :  { %s84_s26 = sshll.u32 %s1631_s25, 4  ;;  %s146_s1 = sshll.u32 %s1611_s15, 4  ;;  %s85_s26 = int_to_ptr.hbm [resolvable:$true] %s84_s26  ;;  %s147_s1 = int_to_ptr.hbm [resolvable:$true] %s146_s1 }
  0x16   :  { %92 = dma.hbm_to_vmem [thread:$0]  %s85_s26, 256, %s87_s27, [#allocation9], %s1252_s30, %s1252_s30, %s1253_s4  }
  0x17   :  { %s114_s6 = sshll.u32 %s1254_s21, 4  ;;  %s148_s25 = sshll.u32 %s1255_s9, 4  ;;  %s115_s6 = int_to_ptr.vmem [resolvable:$true] %s114_s6  ;;  %s149_s25 = int_to_ptr.vmem [resolvable:$true] %s148_s25 }
  0x18   :  { %120 = dma.hbm_to_vmem [thread:$0]  %s113_s29, 384, %s115_s6, [#allocation12], %s1252_s30, %s1252_s30, %s1253_s4  }
  0x19   :  { %s1632_s28 = sld [smem:[#allocation25_spill]]  ;;  %s1256_s23 = smov [#allocation3]  }
  0x1a   :  { %154 = dma.hbm_to_vmem [thread:$0]  %s147_s1, 512, %s149_s25, [#allocation15], %s1252_s30, %s1252_s30, %s1253_s4  }
  0x1b   :  { %s1633_s27 = sld [smem:[#allocation28_spill]]  ;;  %s41_s21 = sshll.u32 %s1256_s23, 4  ;;  %s42_s21 = int_to_ptr.vmem [resolvable:$true] %s41_s21 }
  0x1c   :  { %s1634_s29 = smov 64   ;;  %s1257_s6 = smov [#allocation7]  }
  0x1d   :  { %s69_s9 = sshll.u32 %s1257_s6, 4  ;;  %s127_s15 = sshll.u32 %s1607_s11, 4  ;;  %s70_s9 = int_to_ptr.vmem [resolvable:$true] %s69_s9  ;;  %s128_s15 = int_to_ptr.hbm [resolvable:$true] %s127_s15 }
  0x1e   :  { %s1258_s26 = smov [#allocation10]   ;;  %s1260_s6 = smov [#allocation16]  }
  0x1f   :  { %s39_s5 = sshll.u32 %s1632_s28, 4  ;;  %s99_s28 = sshll.u32 %s1604_s8, 4  ;;  %s40_s5 = int_to_ptr.hbm [resolvable:$true] %s39_s5  ;;  %s100_s28 = int_to_ptr.hbm [resolvable:$true] %s99_s28 }
  0x20   :  { %47 = dma.hbm_to_vmem [thread:$0]  %s40_s5, 128, %s42_s21, [#allocation4], %s1634_s29, %s1634_s29, %s1250_s24  }
  0x21   :  { %s67_s0 = sshll.u32 %s1633_s27, 4  ;;  %s101_s27 = sshll.u32 %s1258_s26, 4  ;;  %s68_s0 = int_to_ptr.hbm [resolvable:$true] %s67_s0  ;;  %s102_s27 = int_to_ptr.vmem [resolvable:$true] %s101_s27 }
  0x22   :  { %75 = dma.hbm_to_vmem [thread:$0]  %s68_s0, 256, %s70_s9, [#allocation6], %s1252_s30, %s1252_s30, %s1253_s4  }
  0x23   :  { %107 = dma.hbm_to_vmem [thread:$0]  %s100_s28, 384, %s102_s27, [#allocation9], %s1252_s30, %s1252_s30, %s1253_s4  }
  0x24   :  { %s1259_s5 = smov [#allocation13]   ;;  %s161_s21 = sshll.u32 %s1613_s17, 4  ;;  %s162_s21 = int_to_ptr.hbm [resolvable:$true] %s161_s21 }
  0x25   :  { %s129_s8 = sshll.u32 %s1259_s5, 4  ;;  %s174_s29 = sshll.u32 %s1614_s18, 4  ;;  %s130_s8 = int_to_ptr.vmem [resolvable:$true] %s129_s8  ;;  %s175_s29 = int_to_ptr.hbm [resolvable:$true] %s174_s29 }
  0x26   :  { %135 = dma.hbm_to_vmem [thread:$0]  %s128_s15, 256, %s130_s8, [#allocation12], %s1252_s30, %s1252_s30, %s1253_s4  }
  0x27   :  { %s163_s9 = sshll.u32 %s1260_s6, 4  ;;  %s1261_s2 = smov [#allocation17]   ;;  %s164_s9 = int_to_ptr.vmem [resolvable:$true] %s163_s9 }
  0x28   :  { %169 = dma.hbm_to_vmem [thread:$0]  %s162_s21, 512, %s164_s9, [#allocation15], %s1252_s30, %s1252_s30, %s1253_s4  }
  0x29   :  { %s176_s17 = sshll.u32 %s1261_s2, 4  ;;  %s177_s17 = int_to_ptr.vmem [resolvable:$true] %s176_s17 }
  0x2a   :  { %182 = dma.hbm_to_vmem [thread:$0]  %s175_s29, 512, %s177_s17, [#allocation18], %s1252_s30, %s1252_s30, %s1253_s4  }
  0x2b   :  { %1236 = dma.done.wait [#allocation4], 128  }
  0x2c   :  { %1237 = vsyncadd [#allocation4], 4294967168 }
  0x2d   :  { %1238 = dma.done.wait [#allocation6], 384  }
  0x2e   :  { %1239 = vsyncadd [#allocation6], 4294966912 }
  0x2f   :  { %1240 = dma.done.wait [#allocation9], 640  }
  0x30   :  { %1241 = vsyncadd [#allocation9], 4294966656 }
  0x31   :  { %1242 = dma.done.wait [#allocation12], 640  }
  0x32   :  { %1243 = vsyncadd [#allocation12], 4294966656 }
  0x33   :  { %1244 = dma.done.wait [#allocation15], 1024  }
  0x34   :  { %1245 = vsyncadd [#allocation15], 4294966272 }
  0x35   :  { %1246 = dma.done.wait [#allocation18], 512  }
  0x36   :  { %1247 = vsyncadd [#allocation18], 4294966784  ;;  %s1635_s28 = sld [smem:[#allocation27_spill]]  ;;  %vm248_vm0 = vcmask 1045504   ;;  %v236_v3 = vld [vmem:[#allocation7] sm:$0xff]  ;;  %vm347_vm1 = vcmask 1044480  }
  0x37   :  { %v237_v5 = vld [vmem:[#allocation7 + $0x8] sm:$0x3]  ;;  %v919_v6 = vld [vmem:[#allocation3] sm:$0xf]  ;;  %v955_v7 = vld [vmem:[#allocation3] sm:$0x10] }
  0x38   :  { %v337_v8 = vpack.c.bf16 %v237_v5, %v236_v3  ;;  %vm244_vm2 = vcmask 97280   ;;  %v928_v9 = vld [vmem:[#allocation5] sm:$0xf]  ;;  %v956_v10 = vld [vmem:[#allocation5] sm:$0x30]  ;;  %v304_v11 = vld [vmem:[#allocation10 + $0x10] sm:$0xff]  ;;  %v1448_v13 = vor.u32 %v955_v7, %v919_v6 }
  0x39   :  { %vm343_vm3 = vcmask 80896   ;;  %325 = vmatpush.msra.mxu2 %v304_v11  ;;  %v303_v14 = vld [vmem:[#allocation10 + $0x8] sm:$0xff]  ;;  %vm305_vm4 = vcmask 195584   ;;  %v267_v15 = vld [vmem:[#allocation8 + $0x8] sm:$0xff]  ;;  %v1451_v17 = vor.u32 %v956_v10, %v928_v9  ;;  %v302_v18 = vld [vmem:[#allocation10] sm:$0xff]  ;;  %vm272_vm5 = vcmask 130048  }
  0x3a   :  { %v349_v16 = vsel %vm347_vm1, %v337_v8, 0  ;;  %293 = vmatpush.msra.mxu1 %v267_v15  ;;  %v266_v19 = vld [vmem:[#allocation8] sm:$0xff]  ;;  %v367_v20 = vld [vmem:[#allocation11 + $0x10] sm:$0xff]  ;;  %v366_v21 = vld [vmem:[#allocation11 + $0x8] sm:$0xff]  ;;  %vm436_vm6 = vcmask 261120   ;;  %vm440_vm7 = vcmask 254976  }
  0x3b   :  { %358 = vmatpush.bf16.msra.mxu3 %v349_v16  ;;  %326 = vmatpush.msra.mxu2 %v303_v14  ;;  %v365_v22 = vld [vmem:[#allocation11] sm:$0xff]  ;;  %v401_v24 = vld [vmem:[#allocation13] sm:$0xff]  ;;  %v974_v29 = vld [vmem:[%s1603_s7] ss:$0 sm:$0xff]  ;;  %vm473_vm8 = vcmask 257024   ;;  %s1638_s1 = sld [smem:[#allocation30_spill]] }
  0x3c   :  { %v234_v1 = vld [vmem:[%s1635_s28] sm:$0xff]  ;;  %v235_v2 = vld [vmem:[%s1635_s28 + $0x8] sm:$0xf]  ;;  %294 = vmatpush.msra.mxu1 %v266_v19  ;;  %v563_v55 = vld [vmem:[%s1610_s14 + $0x18] sm:$0xff]  ;;  %s1639_s26 = sld [smem:[#allocation29_spill]] }
  0x3d   :  { %v238_v4 = vpack.c.bf16 %v235_v2, %v234_v1  ;;  %327 = vmatpush.msra.mxu2 %v302_v18  ;;  %v402_v23 = vld [vmem:[#allocation13 + $0x8] sm:$0xff]  ;;  %v975_v38 = vld [vmem:[%s1606_s10] ss:$0 sm:$0xff] }
  0x3e   :  { %930 = vmatmul.msk.bf16.vlgmr.msra.gmra.mxu3 %vm343_vm3, %v1451_v17  ;;  %924 = vmatmul.msk.f32.vlgmr.msra.gmra.mxu2 %vm305_vm4, %v236_v3  ;;  %v562_v56 = vld [vmem:[%s1610_s14 + $0x10] sm:$0xff]  ;;  %v561_v57 = vld [vmem:[%s1610_s14 + $0x8] sm:$0xff]  ;;  %v560_v58 = vld [vmem:[%s1610_s14] sm:$0xff] }
  0x3f   :  { %v250_v12 = vsel %vm248_vm0, %v238_v4, 0  ;;  %423 = vmatpush.msrb.mxu1 %v402_v23 }
  0x40   :  { %259 = vmatpush.bf16.msra.mxu0 %v250_v12 }
  0x41   :  { %424 = vmatpush.msrb.mxu1 %v401_v24 }
  0x43   :  { %921 = vmatmul.msk.bf16.vlgmr.msra.gmra.mxu0 %vm244_vm2, %v1448_v13 }
  0x44   :  { %391 = vmatpush.msrb.mxu0 %v367_v20 }
  0x46   :  { %925 = vmatmul.msk.f32.gmra.mxu2 %vm305_vm4, %v237_v5  ;;  %392 = vmatpush.msrb.mxu0 %v366_v21 }
  0x48   :  { %393 = vmatpush.msrb.mxu0 %v365_v22 }
  0x4a   :  { %582 = vmatpush.msra.mxu0 %v563_v55  ;;  %v650_v55 = vld [vmem:[#allocation16] sm:$0xff] }
  0x4c   :  { %583 = vmatpush.msra.mxu0 %v562_v56 }
  0x4e   :  { %584 = vmatpush.msra.mxu0 %v561_v57 }
  0x50   :  { %585 = vmatpush.msra.mxu0 %v560_v58 }
  0xc0   :  { %v261_v25 = vpop.f32.mrf.mxu0 }
  0xc1   :  { %922 = vmatmul.msk.f32.vlgmr.msra.gmra.mxu1 %vm272_vm5, %v261_v25  ;;  %v360_v26 = vpop.f32.mrf.mxu3  ;;  %v329_v30 = vpop.f32.mrf.mxu2 }
  0xc2   :  { %931 = vmatmul.msk.f32.vlgmr.msrb.gmra.mxu0 %vm305_vm4, %v360_v26 }
  0xc8   :  { %v263_v27 = vpop.f32.mrf.mxu0 }
  0xc9   :  { %923 = vmatmul.msk.f32.gmra.mxu1 %vm272_vm5, %v263_v27  ;;  %v362_v28 = vpop.f32.mrf.mxu3  ;;  %v332_v37 = vpop.f32.mrf.mxu2 }
  0xca   :  { %932 = vmatmul.msk.f32.gmra.mxu0 %vm305_vm4, %v362_v28 }
  0xd1   :  { %933 = vmatmul.msk.f32.vlgmr.msrb.gmra.mxu1 %vm272_vm5, %v234_v1 }
  0xd9   :  { %934 = vmatmul.msk.f32.gmra.mxu1 %vm272_vm5, %v235_v2 }
 0x13e   :  { %v296_v31 = vpop.f32.mrf.mxu1 }
 0x13f   :  { %v297_v32 = vadd.f32 %v974_v29, %v296_v31  ;;  %v395_v40 = vpop.f32.mrf.mxu0 }
 0x140   :  { %v396_v42 = vadd.f32 %v975_v38, %v395_v40 }
 0x141   :  { %v335_v33 = vadd.f32 %v329_v30, %v297_v32 }
 0x143   :  { %v434_v34 = vmul.f32 %v335_v33, %v335_v33 }
 0x145   :  { %v437_v35 = vsel %vm436_vm6, %v434_v34, 0.0 }
 0x146   :  { %438 = vadd.xlane.f32.xlu1 %v437_v35  ;;  %v299_v36 = vpop.f32.mrf.mxu1 }
 0x147   :  { %v300_v39 = vadd.f32 %v974_v29, %v299_v36  ;;  %v398_v48 = vpop.f32.mrf.mxu0 }
 0x148   :  { %v399_v50 = vadd.f32 %v975_v38, %v398_v48  ;;  %v615_v48 = vld [vmem:[#allocation14 + $0x10] sm:$0xff] }
 0x149   :  { %v1468_v41 = vadd.f32 %v332_v37, %v300_v39 }
 0x14b   :  { %v435_v43 = vmul.f32 %v1468_v41, %v1468_v41 }
 0x14d   :  { %v441_v44 = vsel %vm440_vm7, %v435_v43, 0.0 }
 0x14e   :  { %v426_v45 = vpop.f32.mrf.mxu1  ;;  %442 = vadd.xlane.f32.xlu1 %v441_v44 }
 0x14f   :  { %v1473_v46 = vadd.f32 %v426_v45, %v396_v42  ;;  %v525_v45 = vld [vmem:[%s1608_s12 + $0x10] sm:$0xff] }
 0x151   :  { %v468_v47 = vmul.f32 %v1473_v46, %v1473_v46 }
 0x153   :  { %v470_v49 = vsel %vm436_vm6, %v468_v47, 0.0  ;;  %v523_v47 = vld [vmem:[%s1608_s12] sm:$0xff] }
 0x154   :  { %471 = vadd.xlane.f32.xlu0 %v470_v49  ;;  %v614_v49 = vld [vmem:[#allocation14 + $0x8] sm:$0xff] }
 0x156   :  { %v429_v51 = vpop.f32.mrf.mxu1 }
 0x157   :  { %v1478_v52 = vadd.f32 %v429_v51, %v399_v50  ;;  %v613_v50 = vld [vmem:[#allocation14] sm:$0xff]  ;;  %v653_v51 = vld [vmem:[#allocation16 + $0x18] sm:$0xff] }
 0x159   :  { %v469_v53 = vmul.f32 %v1478_v52, %v1478_v52 }
 0x15b   :  { %v474_v54 = vsel %vm473_vm8, %v469_v53, 0.0  ;;  %v651_v53 = vld [vmem:[#allocation16 + $0x8] sm:$0xff] }
 0x15c   :  { %475 = vadd.xlane.f32.xlu0 %v474_v54 }
 0x1b9   :  { %v439_v59 = vpop.xlane.xlu1 %438 }
 0x1ba   :  { %v444_v60 = vmax.f32 %v439_v59, 1e-24  ;;  %v976_v59 = vld [vmem:[%s1609_s13] ss:$0 sm:$0xff] }
 0x1bc   :  { %980 = vrsqrt.f32 %v444_v60  ;;  %vm452_vm10 = vweird.f32 %v444_v60 }
 0x1c1   :  { %v443_v61 = vpop.xlane.xlu1 %442 }
 0x1c2   :  { %v981_v62 = vpop.eup %980  ;;  %v445_v63 = vmax.f32 %v443_v61, 1e-24 }
 0x1c3   :  { %v447_v0 = vmul.f32 %v981_v62, %v444_v60  ;;  %vm453_vm9 = vweird.f32 %v981_v62 }
 0x1c4   :  { %982 = vrsqrt.f32 %v445_v63  ;;  %vm454_vm11 = vmor %vm452_vm10, %vm453_vm9  ;;  %vm462_vm13 = vweird.f32 %v445_v63 }
 0x1c5   :  { %v448_v1 = vmul.f32 %v981_v62, %v447_v0 }
 0x1c7   :  { %v449_v2 = vmul.f32 0.5, %v448_v1  ;;  %v472_v3 = vpop.xlane.xlu0 %471 }
 0x1c8   :  { %v477_v4 = vmax.f32 %v472_v3, 1e-24  ;;  %v977_v3 = vld [vmem:[%s1612_s16] ss:$0 sm:$0xff] }
 0x1c9   :  { %v450_v5 = vsub.f32 1.5, %v449_v2 }
 0x1ca   :  { %v983_v6 = vpop.eup %982  ;;  %984 = vrsqrt.f32 %v477_v4  ;;  %vm485_vm4 = vweird.f32 %v477_v4 }
 0x1cb   :  { %v451_v7 = vmul.f32 %v981_v62, %v450_v5  ;;  %v457_v8 = vmul.f32 %v983_v6, %v445_v63  ;;  %vm463_vm12 = vweird.f32 %v983_v6 }
 0x1cc   :  { %vm464_vm14 = vmor %vm462_vm13, %vm463_vm12 }
 0x1cd   :  { %v455_v9 = vsel %vm454_vm11, %v981_v62, %v451_v7  ;;  %v458_v10 = vmul.f32 %v983_v6, %v457_v8 }
 0x1ce   :  { %v466_v11 = vmul.f32 %v455_v9, %v335_v33 }
 0x1cf   :  { %v459_v12 = vmul.f32 0.5, %v458_v10  ;;  %v476_v14 = vpop.xlane.xlu0 %475 }
 0x1d0   :  { %v985_v15 = vpop.eup %984  ;;  %v501_v16 = vmax.f32 %v466_v11, 0.0  ;;  %v478_v18 = vmax.f32 %v476_v14, 1e-24 }
 0x1d1   :  { %v460_v19 = vsub.f32 1.5, %v459_v12  ;;  %v480_v20 = vmul.f32 %v985_v15, %v477_v4  ;;  %vm486_vm15 = vweird.f32 %v985_v15 }
 0x1d2   :  { %986 = vrsqrt.f32 %v478_v18  ;;  %938 = vmatmul.msk.f32.vlgmr.msra.gmra.mxu0 %vm436_vm6, %v501_v16  ;;  %vm487_vm5 = vmor %vm485_vm4, %vm486_vm15  ;;  %vm495_vm10 = vweird.f32 %v478_v18 }
 0x1d3   :  { %v481_v21 = vmul.f32 %v985_v15, %v480_v20  ;;  %v461_v22 = vmul.f32 %v983_v6, %v460_v19 }
 0x1d5   :  { %v482_v23 = vmul.f32 0.5, %v481_v21  ;;  %v465_v24 = vsel %vm464_vm14, %v983_v6, %v461_v22  ;;  %vm759_vm14 = vcmask 1041408  }
 0x1d6   :  { %v467_v25 = vmul.f32 %v465_v24, %v1468_v41 }
 0x1d7   :  { %v483_v26 = vsub.f32 1.5, %v482_v23 }
 0x1d8   :  { %v987_v27 = vpop.eup %986  ;;  %v502_v28 = vmax.f32 %v467_v25, 0.0 }
 0x1d9   :  { %v490_v29 = vmul.f32 %v987_v27, %v478_v18  ;;  %v484_v31 = vmul.f32 %v985_v15, %v483_v26  ;;  %vm496_vm9 = vweird.f32 %v987_v27 }
 0x1da   :  { %939 = vmatmul.msk.f32.gmra.mxu0 %vm436_vm6, %v502_v28  ;;  %v595_v30 = vpack.c.bf16 %v502_v28, %v501_v16  ;;  %vm497_vm11 = vmor %vm495_vm10, %vm496_vm9 }
 0x1db   :  { %v491_v32 = vmul.f32 %v987_v27, %v490_v29  ;;  %v488_v36 = vsel %vm487_vm5, %v985_v15, %v484_v31 }
 0x1dc   :  { %v597_v33 = vsel %vm347_vm1, %v595_v30, 0  ;;  %v499_v38 = vmul.f32 %v488_v36, %v1473_v46  ;;  %v524_v46 = vld [vmem:[%s1608_s12 + $0x8] sm:$0xff] }
 0x1dd   :  { %v492_v34 = vmul.f32 0.5, %v491_v32  ;;  %606 = vmatpush.bf16.msra.mxu1 %v597_v33 }
 0x1de   :  { %v503_v41 = vmax.f32 %v499_v38, 0.0 }
 0x1df   :  { %v493_v35 = vsub.f32 1.5, %v492_v34 }
 0x1e0   :  { %940 = vmatmul.msk.bf16.vlgmr.msra.gmra.mxu1 %vm343_vm3, %v1451_v17  ;;  %v526_v17 = vld [vmem:[%s1608_s12 + $0x18] sm:$0xff] }
 0x1e1   :  { %v494_v37 = vmul.f32 %v987_v27, %v493_v35  ;;  %549 = vmatpush.msrb.mxu2 %v526_v17  ;;  %v821_v17 = vld [vmem:[#allocation17 + $0x10] sm:$0xff] }
 0x1e3   :  { %v498_v39 = vsel %vm497_vm11, %v987_v27, %v494_v37  ;;  %550 = vmatpush.msrb.mxu2 %v525_v45 }
 0x1e4   :  { %v500_v40 = vmul.f32 %v498_v39, %v1478_v52  ;;  %v652_v52 = vld [vmem:[#allocation16 + $0x10] sm:$0xff] }
 0x1e5   :  { %551 = vmatpush.msrb.mxu2 %v524_v46 }
 0x1e6   :  { %v504_v42 = vmax.f32 %v500_v40, 0.0 }
 0x1e7   :  { %552 = vmatpush.msrb.mxu2 %v523_v47 }
 0x1e8   :  { %v505_v43 = vpack.c.bf16 %v504_v42, %v503_v41 }
 0x1e9   :  { %672 = vmatpush.msra.mxu2 %v653_v51 }
 0x1ea   :  { %v507_v44 = vsel %vm248_vm0, %v505_v43, 0 }
 0x1eb   :  { %516 = vmatpush.bf16.msrb.mxu3 %v507_v44  ;;  %673 = vmatpush.msra.mxu2 %v652_v52  ;;  %v822_v44 = vld [vmem:[#allocation17 + $0x18] sm:$0xff] }
 0x1ed   :  { %674 = vmatpush.msra.mxu2 %v651_v53 }
 0x1ee   :  { %935 = vmatmul.msk.bf16.vlgmr.msrb.gmra.mxu3 %vm244_vm2, %v1448_v13  ;;  %v616_v13 = vld [vmem:[#allocation14 + $0x18] sm:$0xff] }
 0x1ef   :  { %639 = vmatpush.msra.mxu3 %v616_v13  ;;  %675 = vmatpush.msra.mxu2 %v650_v55  ;;  %v820_v13 = vld [vmem:[#allocation17 + $0x8] sm:$0xff] }
 0x1f0   :  { %v751_v55 = vld [vmem:[%s1638_s1] sm:$0xff] }
 0x1f1   :  { %640 = vmatpush.msra.mxu3 %v615_v48 }
 0x1f3   :  { %641 = vmatpush.msra.mxu3 %v614_v49 }
 0x1f5   :  { %642 = vmatpush.msra.mxu3 %v613_v50  ;;  %v819_v50 = vld [vmem:[#allocation17] sm:$0xff] }
 0x1f7   :  { %845 = vmatpush.msrb.mxu3 %v822_v44 }
 0x1f9   :  { %846 = vmatpush.msrb.mxu3 %v821_v17 }
 0x1fb   :  { %847 = vmatpush.msrb.mxu3 %v820_v13 }
 0x1fd   :  { %848 = vmatpush.msrb.mxu3 %v819_v50 }
 0x24f   :  { %v587_v60 = vpop.f32.mrf.mxu0 }
 0x257   :  { %v590_v5 = vpop.f32.mrf.mxu0 }
 0x25d   :  { %v608_v54 = vpop.f32.mrf.mxu1 }
 0x25e   :  { %941 = vmatmul.msk.f32.vlgmr.msra.gmra.mxu3 %vm436_vm6, %v608_v54 }
 0x265   :  { %v610_v56 = vpop.f32.mrf.mxu1 }
 0x266   :  { %942 = vmatmul.msk.f32.gmra.mxu3 %vm436_vm6, %v610_v56 }
 0x271   :  { %v518_v57 = vpop.f32.mrf.mxu3 }
 0x272   :  { %936 = vmatmul.msk.f32.vlgmr.msrb.gmra.mxu2 %vm436_vm6, %v518_v57 }
 0x279   :  { %v520_v58 = vpop.f32.mrf.mxu3 }
 0x27a   :  { %937 = vmatmul.msk.f32.gmra.mxu2 %vm436_vm6, %v520_v58 }
 0x282   :  { %943 = vmatmul.msk.f32.vlgmr.msra.gmra.mxu2 %vm436_vm6, %v503_v41 }
 0x28a   :  { %944 = vmatmul.msk.f32.gmra.mxu2 %vm436_vm6, %v504_v42 }
 0x2e1   :  { %v644_v6 = vpop.f32.mrf.mxu3 }
 0x2e2   :  { %v645_v8 = vadd.f32 %v977_v3, %v644_v6  ;;  %v861_v6 = vld [vmem:[%s1616_s20 + $0x18] sm:$0xff] }
 0x2e3   :  { %884 = vmatpush.msrb.mxu2 %v861_v6 }
 0x2e9   :  { %v647_v15 = vpop.f32.mrf.mxu3 }
 0x2ea   :  { %v648_v18 = vadd.f32 %v977_v3, %v647_v15 }
 0x2f5   :  { %v554_v61 = vpop.f32.mrf.mxu2 }
 0x2f6   :  { %v555_v62 = vadd.f32 %v976_v59, %v554_v61 }
 0x2f8   :  { %v1527_v63 = vadd.f32 %v587_v60, %v555_v62  ;;  %v752_v62 = vld [vmem:[%s1638_s1 + $0x8] sm:$0xff] }
 0x2fa   :  { %v685_v0 = vmul.f32 %v1527_v63, %v1527_v63 }
 0x2fc   :  { %v687_v1 = vsel %vm436_vm6, %v685_v0, 0.0 }
 0x2fd   :  { %688 = vadd.xlane.f32.xlu0 %v687_v1  ;;  %v557_v2 = vpop.f32.mrf.mxu2 }
 0x2fe   :  { %v558_v4 = vadd.f32 %v976_v59, %v557_v2 }
 0x300   :  { %v594_v7 = vadd.f32 %v590_v5, %v558_v4  ;;  %v749_v4 = vld [vmem:[%s1639_s26] sm:$0xff]  ;;  %v750_v5 = vld [vmem:[%s1639_s26 + $0x8] sm:$0xff] }
 0x302   :  { %v686_v9 = vmul.f32 %v594_v7, %v594_v7 }
 0x304   :  { %v690_v10 = vsel %vm440_vm7, %v686_v9, 0.0 }
 0x305   :  { %v677_v11 = vpop.f32.mrf.mxu2  ;;  %691 = vadd.xlane.f32.xlu2 %v690_v10 }
 0x306   :  { %v1536_v12 = vadd.f32 %v677_v11, %v645_v8  ;;  %v859_v8 = vld [vmem:[%s1616_s20 + $0x8] sm:$0xff] }
 0x308   :  { %v717_v14 = vmul.f32 %v1536_v12, %v1536_v12 }
 0x30a   :  { %v719_v16 = vsel %vm436_vm6, %v717_v14, 0.0 }
 0x30b   :  { %720 = vadd.xlane.f32.xlu1 %v719_v16  ;;  %v858_v16 = vld [vmem:[%s1616_s20] sm:$0xff] }
 0x30d   :  { %v680_v19 = vpop.f32.mrf.mxu2 }
 0x30e   :  { %v1541_v20 = vadd.f32 %v680_v19, %v648_v18  ;;  %v978_v18 = vld [vmem:[%s1615_s19] ss:$0 sm:$0xff] }
 0x310   :  { %v718_v21 = vmul.f32 %v1541_v20, %v1541_v20 }
 0x312   :  { %v722_v22 = vsel %vm473_vm8, %v718_v21, 0.0 }
 0x313   :  { %723 = vadd.xlane.f32.xlu2 %v722_v22 }
 0x370   :  { %v689_v23 = vpop.xlane.xlu0 %688 }
 0x371   :  { %v693_v24 = vmax.f32 %v689_v23, 1e-24 }
 0x373   :  { %988 = vrsqrt.f32 %v693_v24  ;;  %vm701_vm7 = vweird.f32 %v693_v24 }
 0x378   :  { %v692_v25 = vpop.xlane.xlu2 %691 }
 0x379   :  { %v989_v26 = vpop.eup %988  ;;  %v694_v27 = vmax.f32 %v692_v25, 1e-24  ;;  %v1262_v25 = vmov 0  }
 0x37a   :  { %v696_v28 = vmul.f32 %v989_v26, %v693_v24  ;;  %vm702_vm0 = vweird.f32 %v989_v26  ;;  %972 = vset.pattern.permute.xlu2 %v1262_v25  ;;  %973 = vset.pattern.permute.xlu0 %v1262_v25 }
 0x37b   :  { %990 = vrsqrt.f32 %v694_v27  ;;  %vm1546_vm8 = vmor %vm701_vm7, %vm702_vm0  ;;  %vm711_vm12 = vweird.f32 %v694_v27  ;;  %vm792_vm0 = vcmask 1043456  }
 0x37c   :  { %v697_v29 = vmul.f32 %v989_v26, %v696_v28 }
 0x37e   :  { %v721_v30 = vpop.xlane.xlu1 %720  ;;  %v698_v32 = vmul.f32 0.5, %v697_v29 }
 0x37f   :  { %v725_v31 = vmax.f32 %v721_v30, 1e-24 }
 0x380   :  { %v699_v35 = vsub.f32 1.5, %v698_v32 }
 0x381   :  { %v991_v33 = vpop.eup %990  ;;  %992 = vrsqrt.f32 %v725_v31  ;;  %vm733_vm5 = vweird.f32 %v725_v31 }
 0x382   :  { %v706_v34 = vmul.f32 %v991_v33, %v694_v27  ;;  %vm712_vm1 = vweird.f32 %v991_v33  ;;  %v700_v43 = vmul.f32 %v989_v26, %v699_v35 }
 0x383   :  { %vm713_vm13 = vmor %vm711_vm12, %vm712_vm1 }
 0x384   :  { %v707_v36 = vmul.f32 %v991_v33, %v706_v34  ;;  %v704_v49 = vsel %vm1546_vm8, %v989_v26, %v700_v43  ;;  %v979_v26 = vld [vmem:[#allocation2] ss:$0 sm:$0xff] }
 0x385   :  { %v715_v54 = vmul.f32 %v704_v49, %v1527_v63 }
 0x386   :  { %v708_v37 = vmul.f32 0.5, %v707_v36  ;;  %v724_v38 = vpop.xlane.xlu2 %723 }
 0x387   :  { %v993_v39 = vpop.eup %992  ;;  %v726_v40 = vmax.f32 %v724_v38, 1e-24 }
 0x388   :  { %v709_v41 = vsub.f32 1.5, %v708_v37  ;;  %v728_v42 = vmul.f32 %v993_v39, %v725_v31  ;;  %vm734_vm15 = vweird.f32 %v993_v39 }
 0x389   :  { %994 = vrsqrt.f32 %v726_v40  ;;  %vm735_vm9 = vmor %vm733_vm5, %vm734_vm15  ;;  %vm743_vm10 = vweird.f32 %v726_v40 }
 0x38a   :  { %v710_v46 = vmul.f32 %v991_v33, %v709_v41  ;;  %v729_v47 = vmul.f32 %v993_v39, %v728_v42 }
 0x38c   :  { %v714_v48 = vsel %vm713_vm13, %v991_v33, %v710_v46  ;;  %v730_v52 = vmul.f32 0.5, %v729_v47 }
 0x38d   :  { %v716_v51 = vmul.f32 %v714_v48, %v594_v7  ;;  %v860_v7 = vld [vmem:[%s1616_s20 + $0x10] sm:$0xff] }
 0x38e   :  { %v731_v57 = vsub.f32 1.5, %v730_v52  ;;  %885 = vmatpush.msrb.mxu2 %v860_v7 }
 0x38f   :  { %v995_v53 = vpop.eup %994  ;;  %945 = vmatpush.msk.msrb.mxu0 %vm759_vm14, %v716_v51 }
 0x390   :  { %v738_v56 = vmul.f32 %v995_v53, %v726_v40  ;;  %v732_v60 = vmul.f32 %v993_v39, %v731_v57  ;;  %vm744_vm4 = vweird.f32 %v995_v53  ;;  %886 = vmatpush.msrb.mxu2 %v859_v8 }
 0x391   :  { %778 = vmatpush.msrb.mxu0 %v715_v54  ;;  %vm745_vm11 = vmor %vm743_vm10, %vm744_vm4 }
 0x392   :  { %v739_v58 = vmul.f32 %v995_v53, %v738_v56  ;;  %946 = vmatmul.msk.f32.vlgmr.msrb.gmra.mxu0 %vm343_vm3, %v751_v55  ;;  %v736_v1 = vsel %vm735_vm9, %v993_v39, %v732_v60  ;;  %887 = vmatpush.msrb.mxu2 %v858_v16 }
 0x393   :  { %v747_v3 = vmul.f32 %v736_v1, %v1536_v12 }
 0x394   :  { %v740_v59 = vmul.f32 0.5, %v739_v58 }
 0x396   :  { %v741_v61 = vsub.f32 1.5, %v740_v59 }
 0x398   :  { %v742_v63 = vmul.f32 %v995_v53, %v741_v61 }
 0x39a   :  { %v746_v0 = vsel %vm745_vm11, %v995_v53, %v742_v63  ;;  %947 = vmatmul.msk.f32.gmra.mxu0 %vm343_vm3, %v752_v62 }
 0x39b   :  { %v748_v2 = vmul.f32 %v746_v0, %v1541_v20 }
 0x39d   :  { %948 = vmatpush.msk.msrb.mxu1 %vm792_vm0, %v748_v2 }
 0x39f   :  { %811 = vmatpush.msrb.mxu1 %v747_v3 }
 0x3a0   :  { %949 = vmatmul.msk.f32.vlgmr.msrb.gmra.mxu1 %vm244_vm2, %v749_v4 }
 0x3a8   :  { %950 = vmatmul.msk.f32.gmra.mxu1 %vm244_vm2, %v750_v5 }
 0x40f   :  { %v780_v9 = vpop.f32.mrf.mxu0 }
 0x417   :  { %v783_v12 = vpop.f32.mrf.mxu0 }
 0x41d   :  { %v813_v10 = vpop.f32.mrf.mxu1 }
 0x41e   :  { %v814_v11 = vadd.f32 %v813_v10, %v780_v9 }
 0x420   :  { %951 = vmatmul.msk.f32.vlgmr.msrb.gmra.mxu3 %vm436_vm6, %v814_v11 }
 0x425   :  { %v816_v14 = vpop.f32.mrf.mxu1 }
 0x426   :  { %v817_v15 = vadd.f32 %v816_v14, %v783_v12 }
 0x428   :  { %952 = vmatmul.msk.f32.gmra.mxu3 %vm436_vm6, %v817_v15 }
 0x4a3   :  { %v850_v19 = vpop.f32.mrf.mxu3 }
 0x4a4   :  { %v851_v20 = vadd.f32 %v978_v18, %v850_v19 }
 0x4a6   :  { %v856_v21 = vmax.f32 %v851_v20, 0.0 }
 0x4a8   :  { %953 = vmatmul.msk.f32.vlgmr.msrb.gmra.mxu2 %vm436_vm6, %v856_v21 }
 0x4ab   :  { %v853_v22 = vpop.f32.mrf.mxu3 }
 0x4ac   :  { %v854_v23 = vadd.f32 %v978_v18, %v853_v22 }
 0x4ae   :  { %v857_v24 = vmax.f32 %v854_v23, 0.0 }
 0x4b0   :  { %954 = vmatmul.msk.f32.gmra.mxu2 %vm436_vm6, %v857_v24 }
 0x52b   :  { %v889_v27 = vpop.f32.mrf.mxu2 }
 0x52c   :  { %v890_v28 = vadd.f32 %v979_v26, %v889_v27 }
 0x52e   :  { %897 = vperm.xlu2 %972, %v890_v28  }
 0x533   :  { %v892_v29 = vpop.f32.mrf.mxu2 }
 0x534   :  { %v893_v30 = vadd.f32 %v979_v26, %v892_v29 }
 0x536   :  { %902 = vperm.xlu0 %973, %v893_v30  }
 0x588   :  { %v898_v31 = vpop.permute.xlu2 %897 }
 0x589   :  { %905 = vst [vmem:[%s1618_s22] sm:$0xff] %v898_v31 }
 0x5a8   :  { %v903_v32 = vpop.permute.xlu0 %902 }
 0x5a9   :  { %906 = vst [vmem:[%s1618_s22 + $0x8] sm:$0xff] %v903_v32 }
 0x5aa   :  { %911 = vsyncpa [#allocation4], 1 }
 0x5ab   :  { %912 = vsyncpa [#allocation6], 1 }
 0x5ac   :  { %913 = vsyncpa [#allocation9], 1 }
 0x5ad   :  { %914 = vsyncpa [#allocation12], 1 }
 0x5ae   :  { %915 = vsyncpa [#allocation15], 1 }
 0x5af   :  { %916 = vsyncpa [#allocation18], 1 }

</bundles_post_ra>
